<compile_context>
chip_gen: v6e
topology: v6e:2x2x1
jax: 0.10.0
libtpu: 0.0.40
codegen_flags: <defaults>
</compile_context>

<pallas_src>
import numpy as np
import jax
import jax.numpy as jnp
from jax import lax
from jax.experimental import pallas as pl
from jax.experimental.pallas import tpu as pltpu

C_OUT = 32
POOL_HW = 14
P = POOL_HW * POOL_HW          # 196 pooled pixels per channel
FC_IN = C_OUT * P              # 6272
FC_OUT = 10


def fused_cnn_kernel(x_ref, cw_ref, cb_ref, fcw_ref, fcb_ref, out_ref):
    # x_ref:   (16, TB, 196) VMEM  space-to-depth input planes (tap-major)
    # cw_ref:  (9, 32)       SMEM  conv weight, [di*3+dj, c]
    # cb_ref:  (32,)         SMEM  conv bias
    # fcw_ref: (32, 196, 10) VMEM  fc weight, [c, p, o]  (matches NCHW flatten order)
    # fcb_ref: (1, 10)       VMEM  fc bias
    # out_ref: (TB, 10)      VMEM  logits
    tb = out_ref.shape[0]

    def channel_body(c, logits_acc):
        # Per-tap scalar weights for this channel (reused by all 4 pool positions).
        w_c = [cw_ref[t, c] for t in range(9)]

        def conv_at(dh, dw):
            # Conv output at position (2*hp+dh, 2*wp+dw) for every (hp, wp), all TB images.
            acc = jnp.zeros((tb, P), jnp.float32)
            for di in range(3):
                for dj in range(3):
                    plane = x_ref[(dh + di) * 4 + (dw + dj)]        # (TB, 196)
                    acc = acc + w_c[di * 3 + dj] * plane
            return acc

        # 2x2 max-pool over the 4 conv positions inside each window; relu/max commute and
        # the bias is constant per window, so bias + relu are applied once at the end.
        m = conv_at(0, 0)
        m = jnp.maximum(m, conv_at(0, 1))
        m = jnp.maximum(m, conv_at(1, 0))
        m = jnp.maximum(m, conv_at(1, 1))
        pooled_c = jnp.maximum(m + cb_ref[c], 0.0)                  # (TB, 196)

        # FC contribution of this channel: (TB,196) @ (196,10) on the MXU.
        return logits_acc + jnp.dot(pooled_c, fcw_ref[c],
                                    preferred_element_type=jnp.float32)

    logits = lax.fori_loop(0, C_OUT, channel_body,
                           jnp.zeros((tb, FC_OUT), jnp.float32))
    out_ref[...] = logits + fcb_ref[...]


def prepare_params(conv_w, conv_b, fc_w, fc_b):
    """Reorganize PyTorch-layout parameters once, outside the jitted forward."""
    cw_taps = jnp.transpose(conv_w[:, 0].reshape(C_OUT, 9), (1, 0))      # (9, 32)
    fcw_r = jnp.transpose(fc_w.reshape(FC_OUT, C_OUT, P), (1, 2, 0))     # (32, 196, 10)
    return cw_taps, conv_b, fcw_r, fc_b.reshape(1, FC_OUT)


@jax.jit
def cnn_forward(x, cw_taps, conv_b, fcw_r, fcb_r):
    # x: (N, 1, 28, 28) f32, NCHW like the PyTorch module.
    n = x.shape[0]
    tb = min(64, ((n + 7) // 8) * 8)              # images per grid step
    n_pad = ((n + tb - 1) // tb) * tb

    # --- glue: space-to-depth view, plane-major and lane-dense (pure data movement) ---
    xpad = jnp.pad(x[:, 0], ((0, 0), (1, 1), (1, 1)))                    # (N, 30, 30)
    planes = [xpad[:, a:a + 27:2, b:b + 27:2]                            # (N, 14, 14)
              for a in range(4) for b in range(4)]
    xs2d = jnp.stack(planes, axis=0).reshape(16, n, P)                   # (16, N, 196)
    if n_pad != n:
        xs2d = jnp.pad(xs2d, ((0, 0), (0, n_pad - n), (0, 0)))

    flops_per_img = 2 * 36 * C_OUT * P + 2 * FC_IN * FC_OUT
    bytes_accessed = (16 * n_pad * P + 9 * C_OUT + C_OUT
                      + FC_IN * FC_OUT + FC_OUT + n_pad * FC_OUT) * 4

    out = pl.pallas_call(
        fused_cnn_kernel,
        out_shape=jax.ShapeDtypeStruct((n_pad, FC_OUT), jnp.float32),
        grid=(n_pad // tb,),
        in_specs=[
            pl.BlockSpec((16, tb, P), lambda i: (0, i, 0)),
            pl.BlockSpec(memory_space=pltpu.MemorySpace.SMEM),           # conv weights
            pl.BlockSpec(memory_space=pltpu.MemorySpace.SMEM),           # conv bias
            pl.BlockSpec((C_OUT, P, FC_OUT), lambda i: (0, 0, 0)),       # fc_w resident
            pl.BlockSpec((1, FC_OUT), lambda i: (0, 0)),                 # fc_b resident
        ],
        out_specs=pl.BlockSpec((tb, FC_OUT), lambda i: (i, 0)),
        compiler_params=pltpu.CompilerParams(
            dimension_semantics=("parallel",)),
        cost_estimate=pl.CostEstimate(
            flops=n_pad * flops_per_img,
            transcendentals=0,
            bytes_accessed=bytes_accessed),
    )(xs2d, cw_taps, conv_b, fcw_r, fcb_r)
    return out[:n]


if __name__ == "__main__":
    key = jax.random.PRNGKey(0)
    k1, k2, k3, k4, k5 = jax.random.split(key, 5)

    # Deterministic synthetic parameters (PyTorch-style uniform bounds).
    conv_w = jax.random.uniform(k1, (32, 1, 3, 3), jnp.float32, -1.0 / 3.0, 1.0 / 3.0)
    conv_b = jax.random.uniform(k2, (32,), jnp.float32, -1.0 / 3.0, 1.0 / 3.0)
    bound = 1.0 / np.sqrt(FC_IN)
    fc_w = jax.random.uniform(k3, (FC_OUT, FC_IN), jnp.float32, -bound, bound)  # torch Linear: (out, in)
    fc_b = jax.random.uniform(k4, (FC_OUT,), jnp.float32, -bound, bound)

    # Input shape (N, 1, 28, 28) is forced by fc1 expecting 32*14*14 features.
    x = jax.random.normal(k5, (2, 1, 28, 28), jnp.float32)

    params = prepare_params(conv_w, conv_b, fc_w, fc_b)
    out = cnn_forward(x, *params)
    out = jax.block_until_ready(out)

    # float64 numpy reference of the exact PyTorch forward pass.
    xn = np.asarray(x, np.float64)
    wn = np.asarray(conv_w, np.float64)
    bn = np.asarray(conv_b, np.float64)
    fwn = np.asarray(fc_w, np.float64)
    fbn = np.asarray(fc_b, np.float64)

    xp = np.pad(xn[:, 0], ((0, 0), (1, 1), (1, 1)))
    conv = np.zeros((x.shape[0], 32, 28, 28))
    for di in range(3):
        for dj in range(3):
            conv += wn[None, :, 0, di, dj, None, None] * xp[:, None, di:di + 28, dj:dj + 28]
    conv += bn[None, :, None, None]
    relu = np.maximum(conv, 0.0)
    pool = relu.reshape(x.shape[0], 32, 14, 2, 14, 2).max(axis=(3, 5))
    ref = pool.reshape(x.shape[0], -1) @ fwn.T + fbn

    np.testing.assert_allclose(np.asarray(out, np.float64), ref, rtol=2e-3, atol=2e-3)
    print("KERNEL_OK")
</pallas_src>

<mosaic_0001>
module attributes {stable_mosaic.version = 11 : i64} {
  func.func @fused_cnn_kernel(%arg0: i32, %arg1: memref<16x8x196xf32, #tpu.memory_space<vmem>>, %arg2: memref<9x32xf32, #tpu.memory_space<smem>>, %arg3: memref<32xf32, #tpu.memory_space<smem>>, %arg4: memref<32x196x10xf32, #tpu.memory_space<vmem>>, %arg5: memref<1x10xf32, #tpu.memory_space<vmem>>, %arg6: memref<8x10xf32, #tpu.memory_space<vmem>>) attributes {dimension_semantics = [#tpu.dimension_semantics<parallel>], iteration_bounds = array<i64: 1>, scalar_prefetch = 0 : i64, scratch_operands = 0 : i64, tpu.core_type = #tpu.core_type<tc>, window_params = [{transform_indices = @transform_0, window_bounds = array<i64: 16, 8, 196>}, {transform_indices = @transform_1, window_bounds = array<i64: 9, 32>}, {transform_indices = @transform_2, window_bounds = array<i64: 32>}, {pipeline_mode = #tpu.pipeline_mode<synchronous>, transform_indices = @transform_3, window_bounds = array<i64: 32, 196, 10>}, {pipeline_mode = #tpu.pipeline_mode<synchronous>, transform_indices = @transform_4, window_bounds = array<i64: 1, 10>}, {transform_indices = @transform_5, window_bounds = array<i64: 8, 10>}]} {
    %cst = arith.constant 0.000000e+00 : f32
    %0 = vector.broadcast %cst : f32 to vector<8x10xf32>
    %c0_i32 = arith.constant 0 : i32
    %c32_i32 = arith.constant 32 : i32
    %1 = arith.addi %c0_i32, %c32_i32 : i32
    %c1_i32 = arith.constant 1 : i32
    %2 = scf.for %arg7 = %c0_i32 to %1 step %c1_i32 iter_args(%arg8 = %0) -> (vector<8x10xf32>)  : i32 {
      %c0_4 = arith.constant 0 : index
      %7 = arith.index_cast %arg7 : i32 to index
      %8 = memref.load %arg2[%c0_4, %7] : memref<9x32xf32, #tpu.memory_space<smem>>
      %c1 = arith.constant 1 : index
      %9 = arith.index_cast %arg7 : i32 to index
      %10 = memref.load %arg2[%c1, %9] : memref<9x32xf32, #tpu.memory_space<smem>>
      %c2 = arith.constant 2 : index
      %11 = arith.index_cast %arg7 : i32 to index
      %12 = memref.load %arg2[%c2, %11] : memref<9x32xf32, #tpu.memory_space<smem>>
      %c3 = arith.constant 3 : index
      %13 = arith.index_cast %arg7 : i32 to index
      %14 = memref.load %arg2[%c3, %13] : memref<9x32xf32, #tpu.memory_space<smem>>
      %c4 = arith.constant 4 : index
      %15 = arith.index_cast %arg7 : i32 to index
      %16 = memref.load %arg2[%c4, %15] : memref<9x32xf32, #tpu.memory_space<smem>>
      %c5 = arith.constant 5 : index
      %17 = arith.index_cast %arg7 : i32 to index
      %18 = memref.load %arg2[%c5, %17] : memref<9x32xf32, #tpu.memory_space<smem>>
      %c6 = arith.constant 6 : index
      %19 = arith.index_cast %arg7 : i32 to index
      %20 = memref.load %arg2[%c6, %19] : memref<9x32xf32, #tpu.memory_space<smem>>
      %c7 = arith.constant 7 : index
      %21 = arith.index_cast %arg7 : i32 to index
      %22 = memref.load %arg2[%c7, %21] : memref<9x32xf32, #tpu.memory_space<smem>>
      %c8 = arith.constant 8 : index
      %23 = arith.index_cast %arg7 : i32 to index
      %24 = memref.load %arg2[%c8, %23] : memref<9x32xf32, #tpu.memory_space<smem>>
      %cst_5 = arith.constant 0.000000e+00 : f32
      %25 = vector.broadcast %cst_5 : f32 to vector<8x196xf32>
      %c0_6 = arith.constant 0 : index
      %c0_7 = arith.constant 0 : index
      %c0_8 = arith.constant 0 : index
      %26 = vector.load %arg1[%c0_6, %c0_7, %c0_8] : memref<16x8x196xf32, #tpu.memory_space<vmem>>, vector<1x8x196xf32>
      %27 = vector.shape_cast %26 : vector<1x8x196xf32> to vector<8x196xf32>
      %28 = vector.broadcast %8 : f32 to vector<8x196xf32>
      %29 = arith.mulf %28, %27 : vector<8x196xf32>
      %30 = arith.addf %25, %29 : vector<8x196xf32>
      %c1_9 = arith.constant 1 : index
      %c0_10 = arith.constant 0 : index
      %c0_11 = arith.constant 0 : index
      %31 = vector.load %arg1[%c1_9, %c0_10, %c0_11] : memref<16x8x196xf32, #tpu.memory_space<vmem>>, vector<1x8x196xf32>
      %32 = vector.shape_cast %31 : vector<1x8x196xf32> to vector<8x196xf32>
      %33 = vector.broadcast %10 : f32 to vector<8x196xf32>
      %34 = arith.mulf %33, %32 : vector<8x196xf32>
      %35 = arith.addf %30, %34 : vector<8x196xf32>
      %c2_12 = arith.constant 2 : index
      %c0_13 = arith.constant 0 : index
      %c0_14 = arith.constant 0 : index
      %36 = vector.load %arg1[%c2_12, %c0_13, %c0_14] : memref<16x8x196xf32, #tpu.memory_space<vmem>>, vector<1x8x196xf32>
      %37 = vector.shape_cast %36 : vector<1x8x196xf32> to vector<8x196xf32>
      %38 = vector.broadcast %12 : f32 to vector<8x196xf32>
      %39 = arith.mulf %38, %37 : vector<8x196xf32>
      %40 = arith.addf %35, %39 : vector<8x196xf32>
      %c4_15 = arith.constant 4 : index
      %c0_16 = arith.constant 0 : index
      %c0_17 = arith.constant 0 : index
      %41 = vector.load %arg1[%c4_15, %c0_16, %c0_17] : memref<16x8x196xf32, #tpu.memory_space<vmem>>, vector<1x8x196xf32>
      %42 = vector.shape_cast %41 : vector<1x8x196xf32> to vector<8x196xf32>
      %43 = vector.broadcast %14 : f32 to vector<8x196xf32>
      %44 = arith.mulf %43, %42 : vector<8x196xf32>
      %45 = arith.addf %40, %44 : vector<8x196xf32>
      %c5_18 = arith.constant 5 : index
      %c0_19 = arith.constant 0 : index
      %c0_20 = arith.constant 0 : index
      %46 = vector.load %arg1[%c5_18, %c0_19, %c0_20] : memref<16x8x196xf32, #tpu.memory_space<vmem>>, vector<1x8x196xf32>
      %47 = vector.shape_cast %46 : vector<1x8x196xf32> to vector<8x196xf32>
      %48 = vector.broadcast %16 : f32 to vector<8x196xf32>
      %49 = arith.mulf %48, %47 : vector<8x196xf32>
      %50 = arith.addf %45, %49 : vector<8x196xf32>
      %c6_21 = arith.constant 6 : index
      %c0_22 = arith.constant 0 : index
      %c0_23 = arith.constant 0 : index
      %51 = vector.load %arg1[%c6_21, %c0_22, %c0_23] : memref<16x8x196xf32, #tpu.memory_space<vmem>>, vector<1x8x196xf32>
      %52 = vector.shape_cast %51 : vector<1x8x196xf32> to vector<8x196xf32>
      %53 = vector.broadcast %18 : f32 to vector<8x196xf32>
      %54 = arith.mulf %53, %52 : vector<8x196xf32>
      %55 = arith.addf %50, %54 : vector<8x196xf32>
      %c8_24 = arith.constant 8 : index
      %c0_25 = arith.constant 0 : index
      %c0_26 = arith.constant 0 : index
      %56 = vector.load %arg1[%c8_24, %c0_25, %c0_26] : memref<16x8x196xf32, #tpu.memory_space<vmem>>, vector<1x8x196xf32>
      %57 = vector.shape_cast %56 : vector<1x8x196xf32> to vector<8x196xf32>
      %58 = vector.broadcast %20 : f32 to vector<8x196xf32>
      %59 = arith.mulf %58, %57 : vector<8x196xf32>
      %60 = arith.addf %55, %59 : vector<8x196xf32>
      %c9 = arith.constant 9 : index
      %c0_27 = arith.constant 0 : index
      %c0_28 = arith.constant 0 : index
      %61 = vector.load %arg1[%c9, %c0_27, %c0_28] : memref<16x8x196xf32, #tpu.memory_space<vmem>>, vector<1x8x196xf32>
      %62 = vector.shape_cast %61 : vector<1x8x196xf32> to vector<8x196xf32>
      %63 = vector.broadcast %22 : f32 to vector<8x196xf32>
      %64 = arith.mulf %63, %62 : vector<8x196xf32>
      %65 = arith.addf %60, %64 : vector<8x196xf32>
      %c10 = arith.constant 10 : index
      %c0_29 = arith.constant 0 : index
      %c0_30 = arith.constant 0 : index
      %66 = vector.load %arg1[%c10, %c0_29, %c0_30] : memref<16x8x196xf32, #tpu.memory_space<vmem>>, vector<1x8x196xf32>
      %67 = vector.shape_cast %66 : vector<1x8x196xf32> to vector<8x196xf32>
      %68 = vector.broadcast %24 : f32 to vector<8x196xf32>
      %69 = arith.mulf %68, %67 : vector<8x196xf32>
      %70 = arith.addf %65, %69 : vector<8x196xf32>
      %cst_31 = arith.constant 0.000000e+00 : f32
      %71 = vector.broadcast %cst_31 : f32 to vector<8x196xf32>
      %c1_32 = arith.constant 1 : index
      %c0_33 = arith.constant 0 : index
      %c0_34 = arith.constant 0 : index
      %72 = vector.load %arg1[%c1_32, %c0_33, %c0_34] : memref<16x8x196xf32, #tpu.memory_space<vmem>>, vector<1x8x196xf32>
      %73 = vector.shape_cast %72 : vector<1x8x196xf32> to vector<8x196xf32>
      %74 = vector.broadcast %8 : f32 to vector<8x196xf32>
      %75 = arith.mulf %74, %73 : vector<8x196xf32>
      %76 = arith.addf %71, %75 : vector<8x196xf32>
      %c2_35 = arith.constant 2 : index
      %c0_36 = arith.constant 0 : index
      %c0_37 = arith.constant 0 : index
      %77 = vector.load %arg1[%c2_35, %c0_36, %c0_37] : memref<16x8x196xf32, #tpu.memory_space<vmem>>, vector<1x8x196xf32>
      %78 = vector.shape_cast %77 : vector<1x8x196xf32> to vector<8x196xf32>
      %79 = vector.broadcast %10 : f32 to vector<8x196xf32>
      %80 = arith.mulf %79, %78 : vector<8x196xf32>
      %81 = arith.addf %76, %80 : vector<8x196xf32>
      %c3_38 = arith.constant 3 : index
      %c0_39 = arith.constant 0 : index
      %c0_40 = arith.constant 0 : index
      %82 = vector.load %arg1[%c3_38, %c0_39, %c0_40] : memref<16x8x196xf32, #tpu.memory_space<vmem>>, vector<1x8x196xf32>
      %83 = vector.shape_cast %82 : vector<1x8x196xf32> to vector<8x196xf32>
      %84 = vector.broadcast %12 : f32 to vector<8x196xf32>
      %85 = arith.mulf %84, %83 : vector<8x196xf32>
      %86 = arith.addf %81, %85 : vector<8x196xf32>
      %c5_41 = arith.constant 5 : index
      %c0_42 = arith.constant 0 : index
      %c0_43 = arith.constant 0 : index
      %87 = vector.load %arg1[%c5_41, %c0_42, %c0_43] : memref<16x8x196xf32, #tpu.memory_space<vmem>>, vector<1x8x196xf32>
      %88 = vector.shape_cast %87 : vector<1x8x196xf32> to vector<8x196xf32>
      %89 = vector.broadcast %14 : f32 to vector<8x196xf32>
      %90 = arith.mulf %89, %88 : vector<8x196xf32>
      %91 = arith.addf %86, %90 : vector<8x196xf32>
      %c6_44 = arith.constant 6 : index
      %c0_45 = arith.constant 0 : index
      %c0_46 = arith.constant 0 : index
      %92 = vector.load %arg1[%c6_44, %c0_45, %c0_46] : memref<16x8x196xf32, #tpu.memory_space<vmem>>, vector<1x8x196xf32>
      %93 = vector.shape_cast %92 : vector<1x8x196xf32> to vector<8x196xf32>
      %94 = vector.broadcast %16 : f32 to vector<8x196xf32>
      %95 = arith.mulf %94, %93 : vector<8x196xf32>
      %96 = arith.addf %91, %95 : vector<8x196xf32>
      %c7_47 = arith.constant 7 : index
      %c0_48 = arith.constant 0 : index
      %c0_49 = arith.constant 0 : index
      %97 = vector.load %arg1[%c7_47, %c0_48, %c0_49] : memref<16x8x196xf32, #tpu.memory_space<vmem>>, vector<1x8x196xf32>
      %98 = vector.shape_cast %97 : vector<1x8x196xf32> to vector<8x196xf32>
      %99 = vector.broadcast %18 : f32 to vector<8x196xf32>
      %100 = arith.mulf %99, %98 : vector<8x196xf32>
      %101 = arith.addf %96, %100 : vector<8x196xf32>
      %c9_50 = arith.constant 9 : index
      %c0_51 = arith.constant 0 : index
      %c0_52 = arith.constant 0 : index
      %102 = vector.load %arg1[%c9_50, %c0_51, %c0_52] : memref<16x8x196xf32, #tpu.memory_space<vmem>>, vector<1x8x196xf32>
      %103 = vector.shape_cast %102 : vector<1x8x196xf32> to vector<8x196xf32>
      %104 = vector.broadcast %20 : f32 to vector<8x196xf32>
      %105 = arith.mulf %104, %103 : vector<8x196xf32>
      %106 = arith.addf %101, %105 : vector<8x196xf32>
      %c10_53 = arith.constant 10 : index
      %c0_54 = arith.constant 0 : index
      %c0_55 = arith.constant 0 : index
      %107 = vector.load %arg1[%c10_53, %c0_54, %c0_55] : memref<16x8x196xf32, #tpu.memory_space<vmem>>, vector<1x8x196xf32>
      %108 = vector.shape_cast %107 : vector<1x8x196xf32> to vector<8x196xf32>
      %109 = vector.broadcast %22 : f32 to vector<8x196xf32>
      %110 = arith.mulf %109, %108 : vector<8x196xf32>
      %111 = arith.addf %106, %110 : vector<8x196xf32>
      %c11 = arith.constant 11 : index
      %c0_56 = arith.constant 0 : index
      %c0_57 = arith.constant 0 : index
      %112 = vector.load %arg1[%c11, %c0_56, %c0_57] : memref<16x8x196xf32, #tpu.memory_space<vmem>>, vector<1x8x196xf32>
      %113 = vector.shape_cast %112 : vector<1x8x196xf32> to vector<8x196xf32>
      %114 = vector.broadcast %24 : f32 to vector<8x196xf32>
      %115 = arith.mulf %114, %113 : vector<8x196xf32>
      %116 = arith.addf %111, %115 : vector<8x196xf32>
      %117 = arith.maximumf %70, %116 : vector<8x196xf32>
      %cst_58 = arith.constant 0.000000e+00 : f32
      %118 = vector.broadcast %cst_58 : f32 to vector<8x196xf32>
      %c4_59 = arith.constant 4 : index
      %c0_60 = arith.constant 0 : index
      %c0_61 = arith.constant 0 : index
      %119 = vector.load %arg1[%c4_59, %c0_60, %c0_61] : memref<16x8x196xf32, #tpu.memory_space<vmem>>, vector<1x8x196xf32>
      %120 = vector.shape_cast %119 : vector<1x8x196xf32> to vector<8x196xf32>
      %121 = vector.broadcast %8 : f32 to vector<8x196xf32>
      %122 = arith.mulf %121, %120 : vector<8x196xf32>
      %123 = arith.addf %118, %122 : vector<8x196xf32>
      %c5_62 = arith.constant 5 : index
      %c0_63 = arith.constant 0 : index
      %c0_64 = arith.constant 0 : index
      %124 = vector.load %arg1[%c5_62, %c0_63, %c0_64] : memref<16x8x196xf32, #tpu.memory_space<vmem>>, vector<1x8x196xf32>
      %125 = vector.shape_cast %124 : vector<1x8x196xf32> to vector<8x196xf32>
      %126 = vector.broadcast %10 : f32 to vector<8x196xf32>
      %127 = arith.mulf %126, %125 : vector<8x196xf32>
      %128 = arith.addf %123, %127 : vector<8x196xf32>
      %c6_65 = arith.constant 6 : index
      %c0_66 = arith.constant 0 : index
      %c0_67 = arith.constant 0 : index
      %129 = vector.load %arg1[%c6_65, %c0_66, %c0_67] : memref<16x8x196xf32, #tpu.memory_space<vmem>>, vector<1x8x196xf32>
      %130 = vector.shape_cast %129 : vector<1x8x196xf32> to vector<8x196xf32>
      %131 = vector.broadcast %12 : f32 to vector<8x196xf32>
      %132 = arith.mulf %131, %130 : vector<8x196xf32>
      %133 = arith.addf %128, %132 : vector<8x196xf32>
      %c8_68 = arith.constant 8 : index
      %c0_69 = arith.constant 0 : index
      %c0_70 = arith.constant 0 : index
      %134 = vector.load %arg1[%c8_68, %c0_69, %c0_70] : memref<16x8x196xf32, #tpu.memory_space<vmem>>, vector<1x8x196xf32>
      %135 = vector.shape_cast %134 : vector<1x8x196xf32> to vector<8x196xf32>
      %136 = vector.broadcast %14 : f32 to vector<8x196xf32>
      %137 = arith.mulf %136, %135 : vector<8x196xf32>
      %138 = arith.addf %133, %137 : vector<8x196xf32>
      %c9_71 = arith.constant 9 : index
      %c0_72 = arith.constant 0 : index
      %c0_73 = arith.constant 0 : index
      %139 = vector.load %arg1[%c9_71, %c0_72, %c0_73] : memref<16x8x196xf32, #tpu.memory_space<vmem>>, vector<1x8x196xf32>
      %140 = vector.shape_cast %139 : vector<1x8x196xf32> to vector<8x196xf32>
      %141 = vector.broadcast %16 : f32 to vector<8x196xf32>
      %142 = arith.mulf %141, %140 : vector<8x196xf32>
      %143 = arith.addf %138, %142 : vector<8x196xf32>
      %c10_74 = arith.constant 10 : index
      %c0_75 = arith.constant 0 : index
      %c0_76 = arith.constant 0 : index
      %144 = vector.load %arg1[%c10_74, %c0_75, %c0_76] : memref<16x8x196xf32, #tpu.memory_space<vmem>>, vector<1x8x196xf32>
      %145 = vector.shape_cast %144 : vector<1x8x196xf32> to vector<8x196xf32>
      %146 = vector.broadcast %18 : f32 to vector<8x196xf32>
      %147 = arith.mulf %146, %145 : vector<8x196xf32>
      %148 = arith.addf %143, %147 : vector<8x196xf32>
      %c12 = arith.constant 12 : index
      %c0_77 = arith.constant 0 : index
      %c0_78 = arith.constant 0 : index
      %149 = vector.load %arg1[%c12, %c0_77, %c0_78] : memref<16x8x196xf32, #tpu.memory_space<vmem>>, vector<1x8x196xf32>
      %150 = vector.shape_cast %149 : vector<1x8x196xf32> to vector<8x196xf32>
      %151 = vector.broadcast %20 : f32 to vector<8x196xf32>
      %152 = arith.mulf %151, %150 : vector<8x196xf32>
      %153 = arith.addf %148, %152 : vector<8x196xf32>
      %c13 = arith.constant 13 : index
      %c0_79 = arith.constant 0 : index
      %c0_80 = arith.constant 0 : index
      %154 = vector.load %arg1[%c13, %c0_79, %c0_80] : memref<16x8x196xf32, #tpu.memory_space<vmem>>, vector<1x8x196xf32>
      %155 = vector.shape_cast %154 : vector<1x8x196xf32> to vector<8x196xf32>
      %156 = vector.broadcast %22 : f32 to vector<8x196xf32>
      %157 = arith.mulf %156, %155 : vector<8x196xf32>
      %158 = arith.addf %153, %157 : vector<8x196xf32>
      %c14 = arith.constant 14 : index
      %c0_81 = arith.constant 0 : index
      %c0_82 = arith.constant 0 : index
      %159 = vector.load %arg1[%c14, %c0_81, %c0_82] : memref<16x8x196xf32, #tpu.memory_space<vmem>>, vector<1x8x196xf32>
      %160 = vector.shape_cast %159 : vector<1x8x196xf32> to vector<8x196xf32>
      %161 = vector.broadcast %24 : f32 to vector<8x196xf32>
      %162 = arith.mulf %161, %160 : vector<8x196xf32>
      %163 = arith.addf %158, %162 : vector<8x196xf32>
      %164 = arith.maximumf %117, %163 : vector<8x196xf32>
      %cst_83 = arith.constant 0.000000e+00 : f32
      %165 = vector.broadcast %cst_83 : f32 to vector<8x196xf32>
      %c5_84 = arith.constant 5 : index
      %c0_85 = arith.constant 0 : index
      %c0_86 = arith.constant 0 : index
      %166 = vector.load %arg1[%c5_84, %c0_85, %c0_86] : memref<16x8x196xf32, #tpu.memory_space<vmem>>, vector<1x8x196xf32>
      %167 = vector.shape_cast %166 : vector<1x8x196xf32> to vector<8x196xf32>
      %168 = vector.broadcast %8 : f32 to vector<8x196xf32>
      %169 = arith.mulf %168, %167 : vector<8x196xf32>
      %170 = arith.addf %165, %169 : vector<8x196xf32>
      %c6_87 = arith.constant 6 : index
      %c0_88 = arith.constant 0 : index
      %c0_89 = arith.constant 0 : index
      %171 = vector.load %arg1[%c6_87, %c0_88, %c0_89] : memref<16x8x196xf32, #tpu.memory_space<vmem>>, vector<1x8x196xf32>
      %172 = vector.shape_cast %171 : vector<1x8x196xf32> to vector<8x196xf32>
      %173 = vector.broadcast %10 : f32 to vector<8x196xf32>
      %174 = arith.mulf %173, %172 : vector<8x196xf32>
      %175 = arith.addf %170, %174 : vector<8x196xf32>
      %c7_90 = arith.constant 7 : index
      %c0_91 = arith.constant 0 : index
      %c0_92 = arith.constant 0 : index
      %176 = vector.load %arg1[%c7_90, %c0_91, %c0_92] : memref<16x8x196xf32, #tpu.memory_space<vmem>>, vector<1x8x196xf32>
      %177 = vector.shape_cast %176 : vector<1x8x196xf32> to vector<8x196xf32>
      %178 = vector.broadcast %12 : f32 to vector<8x196xf32>
      %179 = arith.mulf %178, %177 : vector<8x196xf32>
      %180 = arith.addf %175, %179 : vector<8x196xf32>
      %c9_93 = arith.constant 9 : index
      %c0_94 = arith.constant 0 : index
      %c0_95 = arith.constant 0 : index
      %181 = vector.load %arg1[%c9_93, %c0_94, %c0_95] : memref<16x8x196xf32, #tpu.memory_space<vmem>>, vector<1x8x196xf32>
      %182 = vector.shape_cast %181 : vector<1x8x196xf32> to vector<8x196xf32>
      %183 = vector.broadcast %14 : f32 to vector<8x196xf32>
      %184 = arith.mulf %183, %182 : vector<8x196xf32>
      %185 = arith.addf %180, %184 : vector<8x196xf32>
      %c10_96 = arith.constant 10 : index
      %c0_97 = arith.constant 0 : index
      %c0_98 = arith.constant 0 : index
      %186 = vector.load %arg1[%c10_96, %c0_97, %c0_98] : memref<16x8x196xf32, #tpu.memory_space<vmem>>, vector<1x8x196xf32>
      %187 = vector.shape_cast %186 : vector<1x8x196xf32> to vector<8x196xf32>
      %188 = vector.broadcast %16 : f32 to vector<8x196xf32>
      %189 = arith.mulf %188, %187 : vector<8x196xf32>
      %190 = arith.addf %185, %189 : vector<8x196xf32>
      %c11_99 = arith.constant 11 : index
      %c0_100 = arith.constant 0 : index
      %c0_101 = arith.constant 0 : index
      %191 = vector.load %arg1[%c11_99, %c0_100, %c0_101] : memref<16x8x196xf32, #tpu.memory_space<vmem>>, vector<1x8x196xf32>
      %192 = vector.shape_cast %191 : vector<1x8x196xf32> to vector<8x196xf32>
      %193 = vector.broadcast %18 : f32 to vector<8x196xf32>
      %194 = arith.mulf %193, %192 : vector<8x196xf32>
      %195 = arith.addf %190, %194 : vector<8x196xf32>
      %c13_102 = arith.constant 13 : index
      %c0_103 = arith.constant 0 : index
      %c0_104 = arith.constant 0 : index
      %196 = vector.load %arg1[%c13_102, %c0_103, %c0_104] : memref<16x8x196xf32, #tpu.memory_space<vmem>>, vector<1x8x196xf32>
      %197 = vector.shape_cast %196 : vector<1x8x196xf32> to vector<8x196xf32>
      %198 = vector.broadcast %20 : f32 to vector<8x196xf32>
      %199 = arith.mulf %198, %197 : vector<8x196xf32>
      %200 = arith.addf %195, %199 : vector<8x196xf32>
      %c14_105 = arith.constant 14 : index
      %c0_106 = arith.constant 0 : index
      %c0_107 = arith.constant 0 : index
      %201 = vector.load %arg1[%c14_105, %c0_106, %c0_107] : memref<16x8x196xf32, #tpu.memory_space<vmem>>, vector<1x8x196xf32>
      %202 = vector.shape_cast %201 : vector<1x8x196xf32> to vector<8x196xf32>
      %203 = vector.broadcast %22 : f32 to vector<8x196xf32>
      %204 = arith.mulf %203, %202 : vector<8x196xf32>
      %205 = arith.addf %200, %204 : vector<8x196xf32>
      %c15 = arith.constant 15 : index
      %c0_108 = arith.constant 0 : index
      %c0_109 = arith.constant 0 : index
      %206 = vector.load %arg1[%c15, %c0_108, %c0_109] : memref<16x8x196xf32, #tpu.memory_space<vmem>>, vector<1x8x196xf32>
      %207 = vector.shape_cast %206 : vector<1x8x196xf32> to vector<8x196xf32>
      %208 = vector.broadcast %24 : f32 to vector<8x196xf32>
      %209 = arith.mulf %208, %207 : vector<8x196xf32>
      %210 = arith.addf %205, %209 : vector<8x196xf32>
      %211 = arith.maximumf %164, %210 : vector<8x196xf32>
      %212 = arith.index_cast %arg7 : i32 to index
      %213 = memref.load %arg3[%212] : memref<32xf32, #tpu.memory_space<smem>>
      %214 = vector.broadcast %213 : f32 to vector<8x196xf32>
      %215 = arith.addf %211, %214 : vector<8x196xf32>
      %cst_110 = arith.constant 0.000000e+00 : f32
      %216 = vector.broadcast %cst_110 : f32 to vector<8x196xf32>
      %217 = arith.maximumf %215, %216 : vector<8x196xf32>
      %218 = arith.index_cast %arg7 : i32 to index
      %c0_111 = arith.constant 0 : index
      %c0_112 = arith.constant 0 : index
      %219 = vector.load %arg4[%218, %c0_111, %c0_112] : memref<32x196x10xf32, #tpu.memory_space<vmem>>, vector<1x196x10xf32>
      %220 = vector.shape_cast %219 : vector<1x196x10xf32> to vector<196x10xf32>
      %cst_113 = arith.constant dense<0.000000e+00> : vector<8x10xf32>
      %221 = tpu.matmul %217, %220, %cst_113 {dimension_numbers = #tpu.dot_dimension_numbers<[1], [0], [0], [1], [0, 0, 1, 1], [], []>} : vector<8x196xf32>, vector<196x10xf32>, vector<8x10xf32> -> vector<8x10xf32>
      %222 = arith.addf %arg8, %221 : vector<8x10xf32>
      scf.yield %222 : vector<8x10xf32>
    }
    %c32_i32_0 = arith.constant 32 : i32
    %c0 = arith.constant 0 : index
    %c0_1 = arith.constant 0 : index
    %3 = vector.load %arg5[%c0, %c0_1] : memref<1x10xf32, #tpu.memory_space<vmem>>, vector<1x10xf32>
    %4 = vector.broadcast %3 : vector<1x10xf32> to vector<8x10xf32>
    %5 = arith.addf %2, %4 : vector<8x10xf32>
    %c0_2 = arith.constant 0 : index
    %c0_3 = arith.constant 0 : index
    %6 = vector.load %arg6[%c0_2, %c0_3] : memref<8x10xf32, #tpu.memory_space<vmem>>, vector<8x10xf32>
    tpu.vector_store %arg6[%c0_2, %c0_3], %5 {strides = array<i32>} : memref<8x10xf32, #tpu.memory_space<vmem>>, vector<8x10xf32>,
    return
  }
  func.func @transform_0(%arg0: i32) -> (i32, i32, i32) {
    %c0_i32 = arith.constant 0 : i32
    %c0_i32_0 = arith.constant 0 : i32
    %c0_i32_1 = arith.constant 0 : i32
    return %c0_i32, %arg0, %c0_i32_0 : i32, i32, i32
  }
  func.func @transform_1(%arg0: i32) -> (i32, i32) {
    %c0_i32 = arith.constant 0 : i32
    %c0_i32_0 = arith.constant 0 : i32
    %c0_i32_1 = arith.constant 0 : i32
    return %c0_i32, %c0_i32_0 : i32, i32
  }
  func.func @transform_2(%arg0: i32) -> i32 {
    %c0_i32 = arith.constant 0 : i32
    %c0_i32_0 = arith.constant 0 : i32
    return %c0_i32 : i32
  }
  func.func @transform_3(%arg0: i32) -> (i32, i32, i32) {
    %c0_i32 = arith.constant 0 : i32
    %c0_i32_0 = arith.constant 0 : i32
    %c0_i32_1 = arith.constant 0 : i32
    %c0_i32_2 = arith.constant 0 : i32
    return %c0_i32, %c0_i32_0, %c0_i32_1 : i32, i32, i32
  }
  func.func @transform_4(%arg0: i32) -> (i32, i32) {
    %c0_i32 = arith.constant 0 : i32
    %c0_i32_0 = arith.constant 0 : i32
    %c0_i32_1 = arith.constant 0 : i32
    return %c0_i32, %c0_i32_0 : i32, i32
  }
  func.func @transform_5(%arg0: i32) -> (i32, i32) {
    %c0_i32 = arith.constant 0 : i32
    %c0_i32_0 = arith.constant 0 : i32
    return %arg0, %c0_i32 : i32, i32
  }
}

</mosaic_0001>

<bundles_post_ra>
// kernel: cnn_forward.1
= control target key start
LH: loop header
LB: loop body
LE: loop exit
PB: predicated region body
PF: predicated region fallthrough
CT: control target
= control target key end

     0   :  { %10 = vsyncpa [#allocation3], 0  ;;  %s1001_s0 = inlined_call_operand.vmem [shape: f32[16,8,196], index: 0, kind: input, shape index: {}]   ;;  %s1002_s1 = inlined_call_operand.vmem [shape: f32[9,32], index: 1, kind: input, shape index: {}]   ;;  %s1003_s2 = inlined_call_operand.vmem [shape: f32[32], index: 2, kind: input, shape index: {}]   ;;  %s1004_s3 = inlined_call_operand.vmem [shape: f32[32,196,10], index: 3, kind: input, shape index: {}]   ;;  %s1005_s4 = inlined_call_operand.vmem [shape: f32[1,10], index: 4, kind: input, shape index: {}]   ;;  %s1006_s5 = inlined_call_operand.vmem [shape: f32[8,10], index: 5, kind: output, shape index: {}]  }
   0x1   :  { %s19_s20 = sshll.u32 %s1002_s1, 4  ;;  %s20_s20 = int_to_ptr.vmem [resolvable:$true] %s19_s20 }
   0x2   :  { %11 = vsyncpa [#allocation5], 0  ;;  %s32_s23 = sshll.u32 %s1003_s2, 4  ;;  %s513_s24 = scalar_lea.vmem %s20_s20, 256  ;;  %s33_s23 = int_to_ptr.vmem [resolvable:$true] %s32_s23 }
   0x3   :  { %p514_p0 = scmp.ne.s32.totalorder %s20_s20, %s513_s24  ;;  %p518_p1 = scmp.lt.s32.totalorder %s20_s20, %s20_s20 }
   0x4   :  { %p519_p2 = scmp.lt.s32.totalorder %s513_s24, %s513_s24 }
   0x6   :  { %p520_p3 = por %p519_p2, %p518_p1 }
   0x8   :  { %p521_p4 = pnand %p520_p3, %p514_p0 }
   0xa   :  { %524 = shalt.err (!%p521_p4)
}
   0xb   :  { %s557_s25 = smov [#allocation2]   ;;  %s558_s26 = smov 128  }
   0xc   :  { %s559_s27 = smov 8   ;;  %s525_s28 = scalar_lea.vmem %s33_s23, 16 }
   0xd   :  { %25 = dma.vmem_to_smem %s20_s20, 256, %s557_s25, [#allocation3], %s558_s26, %s558_s26, %s559_s27  }
   0xe   :  { %p526_p5 = scmp.ne.s32.totalorder %s33_s23, %s525_s28  ;;  %p530_p6 = scmp.lt.s32.totalorder %s33_s23, %s33_s23 }
   0xf   :  { %p531_p7 = scmp.lt.s32.totalorder %s525_s28, %s525_s28 }
  0x11   :  { %p532_p8 = por %p531_p7, %p530_p6 }
  0x13   :  { %p533_p9 = pnand %p532_p8, %p526_p5 }
  0x15   :  { %536 = shalt.err (!%p533_p9)
}
  0x16   :  { %s560_s1 = smov [#allocation4]  }
  0x17   :  { %35 = dma.vmem_to_smem %s33_s23, 16, %s560_s1, [#allocation5]  }
  0x18   :  { %545 = dma.done.wait [#allocation3], 256  }
  0x19   :  { %546 = vsyncadd [#allocation3], 4294967040 }
  0x1a   :  { %547 = dma.done.wait [#allocation5], 16  }
  0x1b   :  { %548 = vsyncadd [#allocation5], 4294967280 }
  0x1c   :  { %46 = sfence }
  0x1d   :  { %v598_v0 = vmov 0.0   ;;  %s600_s2 = smov 0  }
  0x1e LB: > { %v561_v1 = vmov 0.0   ;;  %s303_s29 = smul.u32 200, %s555_s2  ;;  %s54_s30 = sld [smem:[#allocation2 + %s555_s2]]  ;;  %v91_v6 = vld [vmem:[%s1001_s0] sm:$0xff]  ;;  %v92_v7 = vld [vmem:[%s1001_s0 + $0x8] sm:$0xff]  ;;  %v443_v9 = vld [vmem:[%s1001_s0 + $0x10] sm:$0xff]  ;;  %s555_s2 = sphi %s600_s2, %s52_s2   ;;  %v551_v0 = vphi %v598_v0, %v1007_v0  }
  0x1f   : > { %338 = vmatprep.subr.mxu0 %v561_v1  ;;  %s55_s6 = sshra.s32 %s555_s2, 7  ;;  %s613_s7 = sand.u32 127, %s555_s2  ;;  %v444_v10 = vld [vmem:[%s1001_s0 + $0x18] sm:$0xff]  ;;  %v445_v12 = vld [vmem:[%s1001_s0 + $0x20] sm:$0xff]  ;;  %v446_v15 = vld [vmem:[%s1001_s0 + $0x28] sm:$0xff]  ;;  %vm334_vm0 = vcmask 1043456  }
  0x20   : > { %s618_s10 = scalar_lea.vmem %s1004_s3, %s303_s29  ;;  %s620_s11 = sshll.u32 %s55_s6, 7  ;;  %v459_v24 = vld [vmem:[%s1001_s0 + $0x30] sm:$0xff]  ;;  %v704_v28 = vld [vmem:[%s1001_s0 + $0x40] sm:$0xff]  ;;  %v709_v29 = vld [vmem:[%s1001_s0 + $0x48] sm:$0xff]  ;;  %vm330_vm1 = vcmask 556032  }
  0x21   : > { %v320_v2 = vld [vmem:[%s618_s10 + $0x78] sm:$0xff]  ;;  %v319_v3 = vld [vmem:[%s618_s10 + $0x70] sm:$0xff]  ;;  %s477_s12 = sadd.s32 128, %s620_s11  ;;  %s479_s13 = sadd.s32 256, %s620_s11  ;;  %v318_v4 = vld [vmem:[%s618_s10 + $0x68] sm:$0xff] }
  0x22   : > { %339 = vmatpush1.msra.mxu0 %v320_v2  ;;  %s61_s14 = sadd.s32 %s477_s12, %s613_s7  ;;  %s65_s15 = sadd.s32 %s479_s13, %s613_s7  ;;  %v317_v5 = vld [vmem:[%s618_s10 + $0x60] sm:$0xff]  ;;  %v316_v11 = vld [vmem:[%s618_s10 + $0x58] sm:$0xff]  ;;  %v315_v16 = vld [vmem:[%s618_s10 + $0x50] sm:$0xff] }
  0x23   : > { %340 = vmatprep.subr.mxu0 %v561_v1  ;;  %s630_s16 = sld [smem:[#allocation2 + %s61_s14]]  ;;  %s481_s17 = sadd.s32 384, %s620_s11  ;;  %v314_v25 = vld [vmem:[%s618_s10 + $0x48] sm:$0xff]  ;;  %v460_v36 = vld [vmem:[%s1001_s0 + $0x38] sm:$0xff]  ;;  %v313_v37 = vld [vmem:[%s618_s10 + $0x40] sm:$0xff] }
  0x24   : > { %341 = vmatpush1.msra.mxu0 %v319_v3  ;;  %s633_s18 = sld [smem:[#allocation2 + %s65_s15]]  ;;  %s69_s19 = sadd.s32 %s481_s17, %s613_s7  ;;  %v647_v8 = vstv %s54_s30  ;;  %v730_v38 = vld [vmem:[%s1001_s0 + $0x50] sm:$0xff]  ;;  %v735_v39 = vld [vmem:[%s1001_s0 + $0x58] sm:$0xff]  ;;  %v750_v49 = vld [vmem:[%s1001_s0 + $0x60] sm:$0xff] }
  0x25   : > { %342 = vmatprep.subr.mxu0 %v561_v1  ;;  %s638_s20 = sld [smem:[#allocation2 + %s69_s19]]  ;;  %s483_s21 = sadd.s32 512, %s620_s11  ;;  %v94_v13 = vmul.f32 %v647_v8, %v91_v6  ;;  %v95_v14 = vmul.f32 %v647_v8, %v92_v7  ;;  %v162_v18 = vmul.f32 %v443_v9, %v647_v8  ;;  %v163_v19 = vmul.f32 %v444_v10, %v647_v8  ;;  %v312_v48 = vld [vmem:[%s618_s10 + $0x38] sm:$0xff]  ;;  %v755_v50 = vld [vmem:[%s1001_s0 + $0x68] sm:$0xff]  ;;  %v770_v59 = vld [vmem:[%s1001_s0 + $0x80] sm:$0xff] }
  0x26   : > { %343 = vmatpush1.msra.mxu0 %v318_v4  ;;  %s73_s26 = sadd.s32 %s483_s21, %s613_s7  ;;  %s485_s27 = sadd.s32 640, %s620_s11  ;;  %v311_v60 = vld [vmem:[%s618_s10 + $0x30] sm:$0xff]  ;;  %v777_v61 = vld [vmem:[%s1001_s0 + $0x88] sm:$0xff] }
  0x27   : > { %344 = vmatprep.subr.mxu0 %v561_v1  ;;  %s659_s30 = sld [smem:[#allocation2 + %s73_s26]]  ;;  %s77_s8 = sadd.s32 %s485_s27, %s613_s7 }
  0x28   : > { %345 = vmatpush1.msra.mxu0 %v317_v5  ;;  %s665_s13 = sld [smem:[#allocation2 + %s77_s8]]  ;;  %s487_s14 = sadd.s32 768, %s620_s11 }
  0x29   : > { %346 = vmatprep.subr.mxu0 %v561_v1  ;;  %s81_s19 = sadd.s32 %s487_s14, %s613_s7  ;;  %s489_s21 = sadd.s32 896, %s620_s11  ;;  %v678_v17 = vstv %s630_s16 }
  0x2a   : > { %347 = vmatpush1.msra.mxu0 %v316_v11  ;;  %s682_s22 = sld [smem:[#allocation2 + %s81_s19]]  ;;  %s85_s23 = sadd.s32 %s489_s21, %s613_s7  ;;  %v102_v20 = vmul.f32 %v443_v9, %v678_v17  ;;  %v103_v21 = vmul.f32 %v444_v10, %v678_v17  ;;  %v688_v22 = vstv %s633_s18  ;;  %v166_v23 = vmul.f32 %v445_v12, %v678_v17  ;;  %v310_v9 = vld [vmem:[%s618_s10 + $0x28] sm:$0xff]  ;;  %v796_v10 = vld [vmem:[%s1001_s0 + $0x90] sm:$0xff] }
  0x2b   : > { %348 = vmatprep.subr.mxu0 %v561_v1  ;;  %s696_s25 = sld [smem:[#allocation2 + %s85_s23]]  ;;  %s491_s26 = sadd.s32 1024, %s620_s11  ;;  %v110_v26 = vmul.f32 %v445_v12, %v688_v22  ;;  %v111_v27 = vmul.f32 %v446_v15, %v688_v22  ;;  %v712_v30 = vstv %s638_s20  ;;  %v167_v31 = vmul.f32 %v446_v15, %v678_v17 }
  0x2c   : > { %349 = vmatpush1.msra.mxu0 %v315_v16  ;;  %s89_s11 = sadd.s32 %s491_s26, %s613_s7  ;;  %v104_v32 = vadd.f32 %v102_v20, %v94_v13  ;;  %v105_v33 = vadd.f32 %v103_v21, %v95_v14  ;;  %v118_v34 = vmul.f32 %v704_v28, %v712_v30  ;;  %v119_v35 = vmul.f32 %v709_v29, %v712_v30  ;;  %v806_v16 = vld [vmem:[%s1001_s0 + $0x70] sm:$0xff]  ;;  %s297_s28 = sld [smem:[#allocation4 + %s555_s2]] }
  0x2d   : > { %350 = vmatprep.subr.mxu0 %v561_v1  ;;  %s725_s20 = sld [smem:[#allocation2 + %s89_s11]]  ;;  %v738_v40 = vstv %s659_s30  ;;  %v168_v41 = vadd.f32 %v166_v23, %v162_v18  ;;  %v169_v42 = vadd.f32 %v167_v31, %v163_v19  ;;  %v173_v43 = vmul.f32 %v459_v24, %v688_v22  ;;  %v309_v18 = vld [vmem:[%s618_s10 + $0x20] sm:$0xff]  ;;  %v813_v19 = vld [vmem:[%s1001_s0 + $0x98] sm:$0xff]  ;;  %s52_s2 = sadd.s32 1, %s555_s2  }
  0x2e   : > { %351 = vmatpush1.msra.mxu0 %v314_v25  ;;  %v112_v44 = vadd.f32 %v110_v26, %v104_v32  ;;  %v113_v45 = vadd.f32 %v111_v27, %v105_v33  ;;  %v126_v46 = vmul.f32 %v730_v38, %v738_v40  ;;  %v127_v47 = vmul.f32 %v735_v39, %v738_v40  ;;  %v822_v24 = vld [vmem:[%s1001_s0 + $0x78] sm:$0xff]  ;;  %p49_p10 = scmp.ge.s32.totalorder %s52_s2, 32  }
  0x2f   : > { %352 = vmatprep.subr.mxu0 %v561_v1  ;;  %v758_v51 = vstv %s665_s13  ;;  %v174_v52 = vmul.f32 %v460_v36, %v688_v22  ;;  %v175_v53 = vadd.f32 %v173_v43, %v168_v41  ;;  %v177_v54 = vmul.f32 %v730_v38, %v712_v30  ;;  %v308_v33 = vld [vmem:[%s618_s10 + $0x18] sm:$0xff] }
  0x30   : > { %353 = vmatpush1.msra.mxu0 %v313_v37  ;;  %v120_v55 = vadd.f32 %v118_v34, %v112_v44  ;;  %v121_v56 = vadd.f32 %v119_v35, %v113_v45  ;;  %v134_v57 = vmul.f32 %v750_v49, %v758_v51  ;;  %v135_v58 = vmul.f32 %v755_v50, %v758_v51  ;;  %v835_v34 = vld [vmem:[%s1001_s0 + $0xa0] sm:$0xff]  ;;  %v840_v35 = vld [vmem:[%s1001_s0 + $0xa8] sm:$0xff] }
  0x31   : > { %354 = vmatprep.subr.mxu0 %v561_v1  ;;  %v780_v62 = vstv %s682_s22  ;;  %v783_v63 = vstv %s696_s25  ;;  %v176_v2 = vadd.f32 %v174_v52, %v169_v42  ;;  %v178_v3 = vmul.f32 %v735_v39, %v712_v30 }
  0x32   : > { %355 = vmatpush1.msra.mxu0 %v312_v48  ;;  %v128_v4 = vadd.f32 %v126_v46, %v120_v55  ;;  %v129_v5 = vadd.f32 %v127_v47, %v121_v56  ;;  %v142_v6 = vmul.f32 %v770_v59, %v780_v62  ;;  %v143_v7 = vmul.f32 %v777_v61, %v780_v62  ;;  %v307_v47 = vld [vmem:[%s618_s10 + $0x10] sm:$0xff] }
  0x33   : > { %356 = vmatprep.subr.mxu0 %v561_v1  ;;  %v179_v11 = vadd.f32 %v177_v54, %v175_v53  ;;  %v150_v14 = vmul.f32 %v796_v10, %v783_v63  ;;  %v801_v15 = vstv %s725_s20  ;;  %v180_v20 = vadd.f32 %v178_v3, %v176_v2 }
  0x34   : > { %357 = vmatpush1.msra.mxu0 %v311_v60  ;;  %v136_v12 = vadd.f32 %v134_v57, %v128_v4  ;;  %v137_v13 = vadd.f32 %v135_v58, %v129_v5  ;;  %v181_v21 = vmul.f32 %v750_v49, %v738_v40  ;;  %v182_v23 = vmul.f32 %v755_v50, %v738_v40  ;;  %v306_v57 = vld [vmem:[%s618_s10 + $0x8] sm:$0xff] }
  0x35   : > { %358 = vmatprep.subr.mxu0 %v561_v1  ;;  %v188_v25 = vmul.f32 %v806_v16, %v758_v51  ;;  %v151_v31 = vmul.f32 %v813_v19, %v783_v63  ;;  %v189_v32 = vmul.f32 %v822_v24, %v758_v51  ;;  %v192_v41 = vmul.f32 %v796_v10, %v780_v62 }
  0x36   : > { %359 = vmatpush1.msra.mxu0 %v310_v9  ;;  %v144_v26 = vadd.f32 %v142_v6, %v136_v12  ;;  %v145_v27 = vadd.f32 %v143_v7, %v137_v13  ;;  %v183_v36 = vadd.f32 %v181_v21, %v179_v11  ;;  %v184_v37 = vadd.f32 %v182_v23, %v180_v20  ;;  %v305_v9 = vld [vmem:[%s618_s10] sm:$0xff]  ;;  %v879_v11 = vld [vmem:[%s1001_s0 + $0xb0] sm:$0xff]  ;;  %v884_v12 = vld [vmem:[%s1001_s0 + $0xb8] sm:$0xff] }
  0x37   : > { %360 = vmatprep.subr.mxu0 %v561_v1  ;;  %v209_v42 = vmul.f32 %v704_v28, %v647_v8  ;;  %v158_v43 = vmul.f32 %v835_v34, %v801_v15  ;;  %v159_v44 = vmul.f32 %v840_v35, %v801_v15  ;;  %v193_v45 = vmul.f32 %v813_v19, %v780_v62 }
  0x38   : > { %361 = vmatpush1.msra.mxu0 %v309_v18  ;;  %v210_v46 = vmul.f32 %v709_v29, %v647_v8  ;;  %v190_v48 = vadd.f32 %v188_v25, %v183_v36  ;;  %v191_v52 = vadd.f32 %v189_v32, %v184_v37  ;;  %v196_v28 = vmul.f32 %v835_v34, %v783_v63  ;;  %v465_v25 = vld [vmem:[%s1001_s0 + $0xc0] sm:$0xff] }
  0x39   : > { %362 = vmatprep.subr.mxu0 %v561_v1  ;;  %v213_v53 = vmul.f32 %v730_v38, %v678_v17  ;;  %v152_v54 = vadd.f32 %v150_v14, %v144_v26  ;;  %v153_v55 = vadd.f32 %v151_v31, %v145_v27  ;;  %v214_v56 = vmul.f32 %v735_v39, %v678_v17 }
  0x3a   : > { %363 = vmatpush1.msra.mxu0 %v308_v33  ;;  %v217_v29 = vmul.f32 %v750_v49, %v688_v22  ;;  %v194_v58 = vadd.f32 %v192_v41, %v190_v48  ;;  %v197_v60 = vmul.f32 %v840_v35, %v783_v63  ;;  %v218_v3 = vmul.f32 %v755_v50, %v688_v22 }
  0x3b   : > { %364 = vmatprep.subr.mxu0 %v561_v1  ;;  %v215_v2 = vadd.f32 %v213_v53, %v209_v42  ;;  %v195_v4 = vadd.f32 %v193_v45, %v191_v52  ;;  %v216_v5 = vadd.f32 %v214_v56, %v210_v46  ;;  %v221_v6 = vmul.f32 %v770_v59, %v712_v30  ;;  %v468_v42 = vld [vmem:[%s1001_s0 + $0xd8] sm:$0xff] }
  0x3c   : > { %365 = vmatpush1.msra.mxu0 %v307_v47  ;;  %v222_v7 = vmul.f32 %v777_v61, %v712_v30  ;;  %v225_v59 = vmul.f32 %v796_v10, %v738_v40  ;;  %v256_v61 = vmul.f32 %v730_v38, %v647_v8  ;;  %v257_v14 = vmul.f32 %v735_v39, %v647_v8  ;;  %v466_v8 = vld [vmem:[%s1001_s0 + $0xc8] sm:$0xff]  ;;  %v907_v38 = vld [vmem:[%s1001_s0 + $0xd0] sm:$0xff]  ;;  %v329_v39 = vld [vmem:[%s618_s10 + $0xc0] sm:$0xf] }
  0x3d   : > { %366 = vmatprep.subr.mxu0 %v561_v1  ;;  %v219_v13 = vadd.f32 %v217_v29, %v215_v2  ;;  %v203_v18 = vmul.f32 %v879_v11, %v801_v15  ;;  %v204_v20 = vmul.f32 %v884_v12, %v801_v15  ;;  %v220_v21 = vadd.f32 %v218_v3, %v216_v5 }
  0x3e   : > { %367 = vmatpush1.msra.mxu0 %v306_v57  ;;  %v226_v23 = vmul.f32 %v813_v19, %v738_v40  ;;  %v911_v26 = vadd.f32 %v158_v43, %v152_v54  ;;  %v913_v27 = vadd.f32 %v159_v44, %v153_v55  ;;  %v229_v32 = vmul.f32 %v835_v34, %v758_v51  ;;  %v328_v43 = vld [vmem:[%s618_s10 + $0xb8] sm:$0xff]  ;;  %v327_v54 = vld [vmem:[%s618_s10 + $0xb0] sm:$0xff] }
  0x3f   : > { %368 = vmatprep.subr.mxu0 %v561_v1  ;;  %v223_v31 = vadd.f32 %v221_v6, %v219_v13  ;;  %v198_v33 = vadd.f32 %v196_v28, %v194_v58  ;;  %v199_v36 = vadd.f32 %v197_v60, %v195_v4  ;;  %v224_v37 = vadd.f32 %v222_v7, %v220_v21 }
  0x40   : > { %369 = vmatpush1.msra.mxu0 %v305_v9  ;;  %v230_v41 = vmul.f32 %v840_v35, %v758_v51  ;;  %v236_v45 = vmul.f32 %v465_v25, %v780_v62  ;;  %v237_v46 = vmul.f32 %v466_v8, %v780_v62  ;;  %v243_v47 = vmul.f32 %v907_v38, %v783_v63 }
  0x41   : > { %384 = vmatprep.subr.mxu0 %v561_v1  ;;  %v227_v44 = vadd.f32 %v225_v59, %v223_v31  ;;  %v228_v48 = vadd.f32 %v226_v23, %v224_v37  ;;  %v260_v52 = vmul.f32 %v750_v49, %v678_v17  ;;  %v261_v28 = vmul.f32 %v755_v50, %v678_v17  ;;  %v469_v17 = vld [vmem:[%s1001_s0 + $0xe0] sm:$0xff]  ;;  %v470_v50 = vld [vmem:[%s1001_s0 + $0xe8] sm:$0xff] }
  0x42   : > { %473 = vmatpush2.msk.msra.mxu0 %vm334_vm0, %v329_v39  ;;  %v264_v53 = vmul.f32 %v806_v16, %v688_v22  ;;  %v244_v56 = vmul.f32 %v468_v42, %v783_v63  ;;  %v265_v29 = vmul.f32 %v822_v24, %v688_v22  ;;  %v268_v57 = vmul.f32 %v796_v10, %v712_v30  ;;  %v326_v22 = vld [vmem:[%s618_s10 + $0xa8] sm:$0xff]  ;;  %v471_v39 = vld [vmem:[%s1001_s0 + $0xf0] sm:$0xff] }
  0x43   : > { %386 = vmatprep.subr.mxu0 %v561_v1  ;;  %v231_v55 = vadd.f32 %v229_v32, %v227_v44  ;;  %v232_v49 = vadd.f32 %v230_v41, %v228_v48  ;;  %v262_v16 = vadd.f32 %v260_v52, %v256_v61  ;;  %v263_v58 = vadd.f32 %v261_v28, %v257_v14  ;;  %v321_v41 = vld [vmem:[%s618_s10 + $0x80] sm:$0xff] }
  0x44   : > { %387 = vmatpush2.msra.mxu0 %v328_v43  ;;  %v269_v60 = vmul.f32 %v813_v19, %v712_v30  ;;  %v205_v10 = vadd.f32 %v203_v18, %v198_v33  ;;  %v206_v24 = vadd.f32 %v204_v20, %v199_v36  ;;  %v272_v3 = vmul.f32 %v835_v34, %v738_v40  ;;  %v325_v30 = vld [vmem:[%s618_s10 + $0xa0] sm:$0xff] }
  0x45   : > { %388 = vmatprep.subr.mxu0 %v561_v1  ;;  %v238_v2 = vadd.f32 %v236_v45, %v231_v55  ;;  %v239_v4 = vadd.f32 %v237_v46, %v232_v49  ;;  %v266_v5 = vadd.f32 %v264_v53, %v262_v16  ;;  %v267_v6 = vadd.f32 %v265_v29, %v263_v58 }
  0x46   : > { %389 = vmatpush2.msra.mxu0 %v327_v54  ;;  %v273_v7 = vmul.f32 %v840_v35, %v738_v40  ;;  %v250_v19 = vmul.f32 %v469_v17, %v801_v15  ;;  %v251_v9 = vmul.f32 %v470_v50, %v801_v15  ;;  %v276_v13 = vmul.f32 %v879_v11, %v758_v51  ;;  %v324_v40 = vld [vmem:[%s618_s10 + $0x98] sm:$0xff] }
  0x47   : > { %390 = vmatprep.subr.mxu0 %v561_v1  ;;  %v277_v34 = vmul.f32 %v884_v12, %v758_v51  ;;  %v245_v59 = vadd.f32 %v243_v47, %v238_v2  ;;  %v246_v61 = vadd.f32 %v244_v56, %v239_v4  ;;  %v270_v14 = vadd.f32 %v268_v57, %v266_v5  ;;  %v323_v51 = vld [vmem:[%s618_s10 + $0x90] sm:$0xff] }
  0x48   : > { %391 = vmatpush2.msra.mxu0 %v326_v22  ;;  %v271_v18 = vadd.f32 %v269_v60, %v267_v6  ;;  %v280_v21 = vmul.f32 %v907_v38, %v780_v62  ;;  %v281_v11 = vmul.f32 %v468_v42, %v780_v62  ;;  %v207_v12 = vmax.f32 %v911_v26, %v205_v10  ;;  %v472_v62 = vld [vmem:[%s1001_s0 + $0xf8] sm:$0xff] }
  0x49   : > { %392 = vmatprep.subr.mxu0 %v561_v1  ;;  %v274_v35 = vadd.f32 %v272_v3, %v270_v14  ;;  %v208_v23 = vmax.f32 %v913_v27, %v206_v24  ;;  %v284_v25 = vmul.f32 %v469_v17, %v783_v63  ;;  %v285_v8 = vmul.f32 %v470_v50, %v783_v63  ;;  %v322_v27 = vld [vmem:[%s618_s10 + $0x88] sm:$0xff] }
  0x4a   : > { %393 = vmatpush2.msra.mxu0 %v325_v30  ;;  %v275_v20 = vadd.f32 %v273_v7, %v271_v18  ;;  %v252_v38 = vadd.f32 %v250_v19, %v245_v59  ;;  %v253_v31 = vadd.f32 %v251_v9, %v246_v61  ;;  %v291_v36 = vmul.f32 %v471_v39, %v801_v15 }
  0x4b   : > { %394 = vmatprep.subr.mxu0 %v561_v1  ;;  %v278_v26 = vadd.f32 %v276_v13, %v274_v35  ;;  %v292_v37 = vmul.f32 %v472_v62, %v801_v15  ;;  %v298_v48 = vstv %s297_s28  ;;  %vm417_vm2 = vcmask (%p49_p10), 80896  }
  0x4c   : > { %395 = vmatpush2.msra.mxu0 %v324_v40  ;;  %v279_v32 = vadd.f32 %v277_v34, %v275_v20  ;;  %v254_v42 = vmax.f32 %v207_v12, %v252_v38  ;;  %v255_v43 = vmax.f32 %v208_v23, %v253_v31 }
  0x4d   : > { %396 = vmatprep.subr.mxu0 %v561_v1  ;;  %v282_v63 = vadd.f32 %v280_v21, %v278_v26 }
  0x4e   : > { %397 = vmatpush2.msra.mxu0 %v323_v51  ;;  %v283_v33 = vadd.f32 %v281_v11, %v279_v32 }
  0x4f   : > { %398 = vmatprep.subr.mxu0 %v561_v1  ;;  %v286_v44 = vadd.f32 %v284_v25, %v282_v63 }
  0x50   : > { %399 = vmatpush2.msra.mxu0 %v322_v27  ;;  %v287_v45 = vadd.f32 %v285_v8, %v283_v33 }
  0x51   : > { %400 = vmatprep.subr.mxu0 %v561_v1  ;;  %v293_v46 = vadd.f32 %v291_v36, %v286_v44  ;;  %v475_v1 = vld [vmem:[%s1005_s4] ss:$0 sm:$0xff] (%p49_p10) }
  0x52   : > { %401 = vmatpush2.msra.mxu0 %v321_v41  ;;  %v294_v47 = vadd.f32 %v292_v37, %v287_v45 }
  0x53   : > { %v295_v52 = vmax.f32 %v254_v42, %v293_v46 }
  0x54   : > { %v296_v28 = vmax.f32 %v255_v43, %v294_v47 }
  0x55   : > { %v299_v53 = vadd.f32 %v298_v48, %v295_v52 }
  0x56   : > { %v300_v54 = vadd.f32 %v298_v48, %v296_v28 }
  0x57   : > { %v301_v55 = vmax.f32 %v299_v53, 0.0 }
  0x58   : > { %v302_v15 = vmax.f32 %v300_v54, 0.0 }
  0x5a   : > { %474 = vmatprep.mubr.msk.f32.mxu0 %vm330_vm1, %v302_v15 }
  0x5b   : > { %403 = vmatmul.mubr.f32.vlgmr.msra.gmra.mxu0 %v301_v55 }
 0x11a   :  { %51 = sbr.rel (!%p49_p10) target bundleno = 30 (0x1e), region = 71 }
 0x11b   : > { %v404_v56 = vpop.f32.mrf.mxu0 }
 0x11c   : > { %v408_v29 = vadd.f32 %v551_v0, %v404_v56  }
 0x11d   : > { %v406_v57 = vpop.f32.mrf.mxu0 }
 0x11e   : > { %v1007_v0 = vmov %v408_v29  ;;  %v416_v49 = vadd.f32 (%p49_p10), %v475_v1, %v408_v29 }
 0x120   :  { %418 = vst.msk [vmem:[%s1006_s5] sm:$0xff] %vm417_vm2, %v416_v49 }
 0x121   :  { %423 = vsyncpa [#allocation3], 1 }
 0x122   :  { %424 = vsyncpa [#allocation5], 1 }

</bundles_post_ra>
